<compile_context>
chip_gen: v6e
topology: v6e:2x2x1
jax: 0.10.0
libtpu: 0.0.40
codegen_flags: <defaults>
</compile_context>

<pallas_src>
import functools

import jax
import jax.numpy as jnp
from jax import lax
from jax.experimental import pallas as pl
from jax.experimental.pallas import tpu as pltpu


def _round_up(a, b):
    return ((a + b - 1) // b) * b


def _round_down(a, b):
    return (a // b) * b


def _vmem_capacity_bytes(default=64 * 1024 * 1024):
    """Physical VMEM per core; conservative 64 MiB fallback (v7x)."""
    try:
        return int(pltpu.get_tpu_info().vmem_capacity_bytes)
    except Exception:
        return default


# ----------------------------------------------------------------------------
# Kernel 1: streaming segment sum  (acc[b] += sum_{n : batch[n] == b} x[n])
# ----------------------------------------------------------------------------
def _segsum_kernel(batch_ref, x_ref, part_ref, acc_ref, *,
                   steps, tile_n, n_nodes, need_mask):
    c = pl.program_id(0)          # core-split index        ("parallel")
    n = pl.program_id(1)          # node-tile index          ("arbitrary")
    n_graphs = acc_ref.shape[0]

    @pl.when(n == 0)
    def _init():
        acc_ref[...] = jnp.zeros_like(acc_ref)

    x_t = x_ref[...]
    if need_mask:
        # Tail / ghost tiles: zero rows with node id >= N.  The OOB part of a
        # partial block is stale VMEM and may be NaN/Inf, so a select (not a
        # 0*garbage trick) is required.
        row_ids = (c * steps + n) * tile_n + lax.broadcasted_iota(
            jnp.int32, (tile_n, 1), 0)
        x_t = jnp.where(row_ids < n_nodes, x_t, 0)

    # One-hot segment mask for this node tile; segment sum == MXU matmul.
    # TODO(synk): nodes with batch[n] outside [0, B) are silently dropped
    # (valid-input assumption; torch scatter would write OOB or error).
    batch_row = batch_ref[...]                                    # (1, TN)
    graph_ids = lax.broadcasted_iota(jnp.int32, (n_graphs, tile_n), 0)
    mask = (batch_row == graph_ids).astype(x_t.dtype)             # (B, TN)

    acc_ref[...] += jnp.dot(mask, x_t, preferred_element_type=jnp.float32)

    @pl.when(n == pl.num_programs(1) - 1)
    def _finalize():
        part_ref[...] = acc_ref[...][None].astype(part_ref.dtype)


# ----------------------------------------------------------------------------
# Kernel 2: combine partials + linear  (out = glob @ Wg + seg @ Ws + bias)
# ----------------------------------------------------------------------------
def _linear_kernel(glob_ref, parts_ref, wg_ref, ws_ref, b_ref, out_ref):
    seg = jnp.sum(parts_ref[...], axis=0)                         # (B, H) f32
    out = (jnp.dot(glob_ref[...], wg_ref[...],
                   preferred_element_type=jnp.float32)
           + jnp.dot(seg, ws_ref[...],
                     preferred_element_type=jnp.float32)
           + b_ref[...])
    out_ref[...] = out.astype(out_ref.dtype)


def decoder_forward(x, glob, batch, weight, bias, *, num_core_splits=2):
    """x: [N, H], glob: [B, H], batch: [N] int, weight: [H, 2H] (PyTorch
    Linear layout), bias: [H]."""
    N, H = x.shape
    B = glob.shape[0]

    x_itemsize = jnp.dtype(x.dtype).itemsize
    w_itemsize = jnp.dtype(weight.dtype).itemsize
    out_dtype = jnp.result_type(x.dtype, glob.dtype, weight.dtype)

    vmem_cap = _vmem_capacity_bytes()

    # ---- node-tile size: sized by BYTES, generation aware -------------------
    row_bytes = max(H * x_itemsize, 1)
    if vmem_cap >= 96 * 1024 * 1024:          # v5e / v6e (128 MiB VMEM)
        target_tile_bytes = 16 * 1024 * 1024
    else:                                     # v7x (64 MiB VMEM)
        target_tile_bytes = 4 * 1024 * 1024
    tn_cap = max(128, _round_down(int(vmem_cap * 0.3) // row_bytes, 128))
    tn = max(128, _round_down(target_tile_bytes // row_bytes, 128))
    tn = min(tn, tn_cap, _round_up(N, 128))

    grid_n = pl.cdiv(N, tn)
    splits = max(1, min(int(num_core_splits), grid_n))
    steps = pl.cdiv(grid_n, splits)
    total_tiles = splits * steps
    need_mask = (total_tiles * tn != N)       # tail tile and/or ghost tiles

    def _tile_index(c, n):
        t = c * steps + n
        if total_tiles != grid_n:             # ghost tiles -> clamp the DMA
            t = jnp.minimum(t, grid_n - 1)
        return t

    # ---- cheap glue (no copy of x): batch -> (1, N), split W^T --------------
    batch2d = batch.astype(jnp.int32).reshape(1, N)
    w_t = weight.T                                           # [2H, H]
    wg = w_t[:H, :]                                          # glob half
    ws = w_t[H:, :]                                          # seg-sum half
    bias2d = bias.reshape(1, H)

    # ---- VMEM budget for the streaming kernel --------------------------------
    bh_pad = _round_up(max(B, 8), 8) * _round_up(H, 128) * 4
    need1 = (2 * tn * row_bytes               # double-buffered x tiles
             + 2 * 8 * tn * 4                 # double-buffered batch tiles
             + bh_pad                         # acc scratch
             + 2 * bh_pad                     # partial output block
             + (2 << 20))
    vmem1 = max(min(need1 + (2 << 20), int(vmem_cap * 0.9)), need1)

    cost1 = pl.CostEstimate(
        flops=2 * B * total_tiles * tn * H,
        transcendentals=0,
        bytes_accessed=N * H * x_itemsize + N * 4 + splits * B * H * 4,
    )

    partials = pl.pallas_call(
        functools.partial(_segsum_kernel, steps=steps, tile_n=tn,
                          n_nodes=N, need_mask=need_mask),
        out_shape=jax.ShapeDtypeStruct((splits, B, H), jnp.float32),
        grid_spec=pltpu.PrefetchScalarGridSpec(
            num_scalar_prefetch=0,
            grid=(splits, steps),
            in_specs=[
                pl.BlockSpec((1, tn), lambda c, n: (0, _tile_index(c, n))),
                pl.BlockSpec((tn, H), lambda c, n: (_tile_index(c, n), 0)),
            ],
            out_specs=pl.BlockSpec((1, B, H), lambda c, n: (c, 0, 0)),
            scratch_shapes=[pltpu.VMEM((B, H), jnp.float32)],
        ),
        compiler_params=pltpu.CompilerParams(
            dimension_semantics=("parallel", "arbitrary"),
            vmem_limit_bytes=vmem1,
        ),
        cost_estimate=cost1,
    )(batch2d, x)

    # ---- tiny finalize kernel: combine partials + linear ---------------------
    if H % 128 == 0 and H > 1024:
        th = 1024                              # tile the output-H axis
    else:
        th = H                                 # single block (e.g. H=32)
    grid_h = pl.cdiv(H, th)

    need2 = (4 * H * th * w_itemsize           # Wg + Ws tiles (double-buffered)
             + (splits + 2) * bh_pad           # partials + glob + acc slack
             + 4 * 8 * _round_up(th, 128) * 4  # bias + out tiles
             + (2 << 20))
    vmem2 = max(min(need2 + (2 << 20), int(vmem_cap * 0.9)), need2)

    cost2 = pl.CostEstimate(
        flops=4 * B * H * H,
        transcendentals=0,
        bytes_accessed=(2 * H * H + H) * w_itemsize
                       + (splits + 1) * B * H * 4
                       + B * H * jnp.dtype(glob.dtype).itemsize,
    )

    out = pl.pallas_call(
        _linear_kernel,
        out_shape=jax.ShapeDtypeStruct((B, H), out_dtype),
        grid_spec=pltpu.PrefetchScalarGridSpec(
            num_scalar_prefetch=0,
            grid=(grid_h,),
            in_specs=[
                pl.BlockSpec((B, H), lambda j: (0, 0)),             # glob
                pl.BlockSpec((splits, B, H), lambda j: (0, 0, 0)),  # partials
                pl.BlockSpec((H, th), lambda j: (0, j)),            # Wg cols
                pl.BlockSpec((H, th), lambda j: (0, j)),            # Ws cols
                pl.BlockSpec((1, th), lambda j: (0, j)),            # bias
            ],
            out_specs=pl.BlockSpec((B, th), lambda j: (0, j)),
        ),
        compiler_params=pltpu.CompilerParams(
            dimension_semantics=("parallel",),
            vmem_limit_bytes=vmem2,
        ),
        cost_estimate=cost2,
    )(glob, partials, wg, ws, bias2d)

    return out


def decoder_reference(x, glob, batch, weight, bias):
    B, H = glob.shape
    seg = jnp.zeros((B, H), jnp.float32).at[batch].add(x)
    cat = jnp.concatenate([glob, seg], axis=1)
    return cat @ weight.T + bias


if __name__ == "__main__":
    n_hidden = 32
    n_nodes = 8
    n_graphs = 2

    key = jax.random.PRNGKey(0)
    k_x, k_g, k_w, k_b = jax.random.split(key, 4)

    x = jax.random.normal(k_x, (n_nodes, n_hidden), jnp.float32)
    glob = jax.random.normal(k_g, (n_graphs, n_hidden), jnp.float32)
    # Deterministic graph assignment: first half -> graph 0, rest -> graph 1.
    batch = jnp.array([0, 0, 0, 0, 1, 1, 1, 1], jnp.int32)

    # Deterministic Linear(n_hidden*2, n_hidden) parameters.
    weight = jax.random.normal(k_w, (n_hidden, n_hidden * 2), jnp.float32) * 0.1
    bias = jax.random.normal(k_b, (n_hidden,), jnp.float32) * 0.1

    fwd = jax.jit(decoder_forward)
    out = jax.block_until_ready(fwd(x, glob, batch, weight, bias))

    ref = decoder_reference(x, glob, batch, weight, bias)
    assert out.shape == (n_graphs, n_hidden)
    assert jnp.allclose(out, ref, atol=1e-4, rtol=1e-4), "mismatch vs reference"

    print("KERNEL_OK")
</pallas_src>

<mosaic_0001>
module attributes {stable_mosaic.version = 11 : i64} {
  func.func @_segsum_kernel(%arg0: i32, %arg1: i32, %arg2: memref<1x128xi32, #tpu.memory_space<vmem>>, %arg3: memref<128x32xf32, #tpu.memory_space<vmem>>, %arg4: memref<1x2x32xf32, #tpu.memory_space<vmem>>, %arg5: memref<2x32xf32, #tpu.memory_space<vmem>>) attributes {dimension_semantics = [#tpu.dimension_semantics<parallel>, #tpu.dimension_semantics<arbitrary>], iteration_bounds = array<i64: 1, 1>, scalar_prefetch = 0 : i64, scratch_operands = 1 : i64, tpu.core_type = #tpu.core_type<tc>, window_params = [{transform_indices = @transform_0, window_bounds = array<i64: 1, 128>}, {transform_indices = @transform_1, window_bounds = array<i64: 128, 32>}, {transform_indices = @transform_2, window_bounds = array<i64: 1, 2, 32>}]} {
    %c0_i32 = arith.constant 0 : i32
    %0 = arith.cmpi eq, %arg1, %c0_i32 : i32
    %1 = arith.extui %0 : i1 to i32
    %c0_i32_0 = arith.constant 0 : i32
    %2 = arith.cmpi ne, %1, %c0_i32_0 : i32
    scf.if %2 {
      %cst_11 = arith.constant 0.000000e+00 : f32
      %30 = vector.broadcast %cst_11 : f32 to vector<2x32xf32>
      %c0_12 = arith.constant 0 : index
      %c0_13 = arith.constant 0 : index
      %31 = vector.load %arg5[%c0_12, %c0_13] : memref<2x32xf32, #tpu.memory_space<vmem>>, vector<2x32xf32>
      tpu.vector_store %arg5[%c0_12, %c0_13], %30 {strides = array<i32>} : memref<2x32xf32, #tpu.memory_space<vmem>>, vector<2x32xf32>,
    } else {
    }
    %c0 = arith.constant 0 : index
    %c0_1 = arith.constant 0 : index
    %3 = vector.load %arg3[%c0, %c0_1] : memref<128x32xf32, #tpu.memory_space<vmem>>, vector<128x32xf32>
    %c1_i32 = arith.constant 1 : i32
    %4 = arith.muli %arg0, %c1_i32 : i32
    %5 = arith.addi %4, %arg1 : i32
    %c128_i32 = arith.constant 128 : i32
    %6 = arith.muli %5, %c128_i32 : i32
    %7 = tpu.iota {dimensions = array<i32: 0>} : vector<128x1xi32>
    %8 = vector.broadcast %6 : i32 to vector<128x1xi32>
    %9 = arith.addi %8, %7 : vector<128x1xi32>
    %c8_i32 = arith.constant 8 : i32
    %10 = vector.broadcast %c8_i32 : i32 to vector<128x1xi32>
    %11 = arith.cmpi slt, %9, %10 : vector<128x1xi32>
    %c0_i32_2 = arith.constant 0 : i32
    %12 = arith.sitofp %c0_i32_2 : i32 to f32
    %13 = vector.shape_cast %11 : vector<128x1xi1> to vector<128x1xi1>
    %14 = vector.broadcast %13 : vector<128x1xi1> to vector<128x32xi1>
    %15 = vector.broadcast %12 : f32 to vector<128x32xf32>
    %16 = arith.select %14, %3, %15 : vector<128x32xi1>, vector<128x32xf32>
    %c0_3 = arith.constant 0 : index
    %c0_4 = arith.constant 0 : index
    %17 = vector.load %arg2[%c0_3, %c0_4] : memref<1x128xi32, #tpu.memory_space<vmem>>, vector<1x128xi32>
    %18 = tpu.iota {dimensions = array<i32: 0>} : vector<2x128xi32>
    %19 = vector.broadcast %17 : vector<1x128xi32> to vector<2x128xi32>
    %20 = arith.cmpi eq, %19, %18 : vector<2x128xi32>
    %21 = arith.extui %20 : vector<2x128xi1> to vector<2x128xi32>
    %22 = arith.sitofp %21 : vector<2x128xi32> to vector<2x128xf32>
    %c0_5 = arith.constant 0 : index
    %c0_6 = arith.constant 0 : index
    %23 = vector.load %arg5[%c0_5, %c0_6] : memref<2x32xf32, #tpu.memory_space<vmem>>, vector<2x32xf32>
    %cst = arith.constant dense<0.000000e+00> : vector<2x32xf32>
    %24 = tpu.matmul %22, %16, %cst {dimension_numbers = #tpu.dot_dimension_numbers<[1], [0], [0], [1], [0, 0, 1, 1], [], []>} : vector<2x128xf32>, vector<128x32xf32>, vector<2x32xf32> -> vector<2x32xf32>
    %25 = arith.addf %23, %24 : vector<2x32xf32>
    %c0_7 = arith.constant 0 : index
    %c0_8 = arith.constant 0 : index
    %26 = vector.load %arg5[%c0_7, %c0_8] : memref<2x32xf32, #tpu.memory_space<vmem>>, vector<2x32xf32>
    tpu.vector_store %arg5[%c0_7, %c0_8], %25 {strides = array<i32>} : memref<2x32xf32, #tpu.memory_space<vmem>>, vector<2x32xf32>,
    %c0_i32_9 = arith.constant 0 : i32
    %27 = arith.cmpi eq, %arg1, %c0_i32_9 : i32
    %28 = arith.extui %27 : i1 to i32
    %c0_i32_10 = arith.constant 0 : i32
    %29 = arith.cmpi ne, %28, %c0_i32_10 : i32
    scf.if %29 {
      %c0_11 = arith.constant 0 : index
      %c0_12 = arith.constant 0 : index
      %30 = vector.load %arg5[%c0_11, %c0_12] : memref<2x32xf32, #tpu.memory_space<vmem>>, vector<2x32xf32>
      %31 = vector.shape_cast %30 : vector<2x32xf32> to vector<1x2x32xf32>
      %c0_13 = arith.constant 0 : index
      %c0_14 = arith.constant 0 : index
      %c0_15 = arith.constant 0 : index
      %32 = vector.load %arg4[%c0_13, %c0_14, %c0_15] : memref<1x2x32xf32, #tpu.memory_space<vmem>>, vector<1x2x32xf32>
      tpu.vector_store %arg4[%c0_13, %c0_14, %c0_15], %31 {strides = array<i32>} : memref<1x2x32xf32, #tpu.memory_space<vmem>>, vector<1x2x32xf32>,
    } else {
    }
    return
  }
  func.func @transform_0(%arg0: i32, %arg1: i32) -> (i32, i32) {
    %c1_i32 = arith.constant 1 : i32
    %0 = arith.muli %arg0, %c1_i32 : i32
    %1 = arith.addi %0, %arg1 : i32
    %c0_i32 = arith.constant 0 : i32
    %c0_i32_0 = arith.constant 0 : i32
    return %c0_i32, %1 : i32, i32
  }
  func.func @transform_1(%arg0: i32, %arg1: i32) -> (i32, i32) {
    %c1_i32 = arith.constant 1 : i32
    %0 = arith.muli %arg0, %c1_i32 : i32
    %1 = arith.addi %0, %arg1 : i32
    %c0_i32 = arith.constant 0 : i32
    %c0_i32_0 = arith.constant 0 : i32
    return %1, %c0_i32 : i32, i32
  }
  func.func @transform_2(%arg0: i32, %arg1: i32) -> (i32, i32, i32) {
    %c0_i32 = arith.constant 0 : i32
    %c0_i32_0 = arith.constant 0 : i32
    %c0_i32_1 = arith.constant 0 : i32
    return %arg0, %c0_i32, %c0_i32_0 : i32, i32, i32
  }
}

module attributes {stable_mosaic.version = 11 : i64} {
  func.func @_linear_kernel(%arg0: i32, %arg1: memref<2x32xf32, #tpu.memory_space<vmem>>, %arg2: memref<1x2x32xf32, #tpu.memory_space<vmem>>, %arg3: memref<32x32xf32, #tpu.memory_space<vmem>>, %arg4: memref<32x32xf32, #tpu.memory_space<vmem>>, %arg5: memref<1x32xf32, #tpu.memory_space<vmem>>, %arg6: memref<2x32xf32, #tpu.memory_space<vmem>>) attributes {dimension_semantics = [#tpu.dimension_semantics<parallel>], iteration_bounds = array<i64: 1>, scalar_prefetch = 0 : i64, scratch_operands = 0 : i64, tpu.core_type = #tpu.core_type<tc>, window_params = [{pipeline_mode = #tpu.pipeline_mode<synchronous>, transform_indices = @transform_0, window_bounds = array<i64: 2, 32>}, {pipeline_mode = #tpu.pipeline_mode<synchronous>, transform_indices = @transform_1, window_bounds = array<i64: 1, 2, 32>}, {transform_indices = @transform_2, window_bounds = array<i64: 32, 32>}, {transform_indices = @transform_3, window_bounds = array<i64: 32, 32>}, {transform_indices = @transform_4, window_bounds = array<i64: 1, 32>}, {transform_indices = @transform_5, window_bounds = array<i64: 2, 32>}]} {
    %c0 = arith.constant 0 : index
    %c0_0 = arith.constant 0 : index
    %c0_1 = arith.constant 0 : index
    %0 = vector.load %arg2[%c0, %c0_0, %c0_1] : memref<1x2x32xf32, #tpu.memory_space<vmem>>, vector<1x2x32xf32>
    %cst = arith.constant dense<0.000000e+00> : vector<2x32xf32>
    %1 = vector.multi_reduction <add>, %0, %cst [0] : vector<1x2x32xf32> to vector<2x32xf32>
    %c0_2 = arith.constant 0 : index
    %c0_3 = arith.constant 0 : index
    %2 = vector.load %arg1[%c0_2, %c0_3] : memref<2x32xf32, #tpu.memory_space<vmem>>, vector<2x32xf32>
    %c0_4 = arith.constant 0 : index
    %c0_5 = arith.constant 0 : index
    %3 = vector.load %arg3[%c0_4, %c0_5] : memref<32x32xf32, #tpu.memory_space<vmem>>, vector<32x32xf32>
    %cst_6 = arith.constant dense<0.000000e+00> : vector<2x32xf32>
    %4 = tpu.matmul %2, %3, %cst_6 {dimension_numbers = #tpu.dot_dimension_numbers<[1], [0], [0], [1], [0, 0, 1, 1], [], []>} : vector<2x32xf32>, vector<32x32xf32>, vector<2x32xf32> -> vector<2x32xf32>
    %c0_7 = arith.constant 0 : index
    %c0_8 = arith.constant 0 : index
    %5 = vector.load %arg4[%c0_7, %c0_8] : memref<32x32xf32, #tpu.memory_space<vmem>>, vector<32x32xf32>
    %cst_9 = arith.constant dense<0.000000e+00> : vector<2x32xf32>
    %6 = tpu.matmul %1, %5, %cst_9 {dimension_numbers = #tpu.dot_dimension_numbers<[1], [0], [0], [1], [0, 0, 1, 1], [], []>} : vector<2x32xf32>, vector<32x32xf32>, vector<2x32xf32> -> vector<2x32xf32>
    %7 = arith.addf %4, %6 : vector<2x32xf32>
    %c0_10 = arith.constant 0 : index
    %c0_11 = arith.constant 0 : index
    %8 = vector.load %arg5[%c0_10, %c0_11] : memref<1x32xf32, #tpu.memory_space<vmem>>, vector<1x32xf32>
    %9 = vector.broadcast %8 : vector<1x32xf32> to vector<2x32xf32>
    %10 = arith.addf %7, %9 : vector<2x32xf32>
    %c0_12 = arith.constant 0 : index
    %c0_13 = arith.constant 0 : index
    %11 = vector.load %arg6[%c0_12, %c0_13] : memref<2x32xf32, #tpu.memory_space<vmem>>, vector<2x32xf32>
    tpu.vector_store %arg6[%c0_12, %c0_13], %10 {strides = array<i32>} : memref<2x32xf32, #tpu.memory_space<vmem>>, vector<2x32xf32>,
    return
  }
  func.func @transform_0(%arg0: i32) -> (i32, i32) {
    %c0_i32 = arith.constant 0 : i32
    %c0_i32_0 = arith.constant 0 : i32
    %c0_i32_1 = arith.constant 0 : i32
    return %c0_i32, %c0_i32_0 : i32, i32
  }
  func.func @transform_1(%arg0: i32) -> (i32, i32, i32) {
    %c0_i32 = arith.constant 0 : i32
    %c0_i32_0 = arith.constant 0 : i32
    %c0_i32_1 = arith.constant 0 : i32
    %c0_i32_2 = arith.constant 0 : i32
    return %c0_i32, %c0_i32_0, %c0_i32_1 : i32, i32, i32
  }
  func.func @transform_2(%arg0: i32) -> (i32, i32) {
    %c0_i32 = arith.constant 0 : i32
    %c0_i32_0 = arith.constant 0 : i32
    return %c0_i32, %arg0 : i32, i32
  }
  func.func @transform_3(%arg0: i32) -> (i32, i32) {
    %c0_i32 = arith.constant 0 : i32
    %c0_i32_0 = arith.constant 0 : i32
    return %c0_i32, %arg0 : i32, i32
  }
  func.func @transform_4(%arg0: i32) -> (i32, i32) {
    %c0_i32 = arith.constant 0 : i32
    %c0_i32_0 = arith.constant 0 : i32
    return %c0_i32, %arg0 : i32, i32
  }
  func.func @transform_5(%arg0: i32) -> (i32, i32) {
    %c0_i32 = arith.constant 0 : i32
    %c0_i32_0 = arith.constant 0 : i32
    return %c0_i32, %arg0 : i32, i32
  }
}

</mosaic_0001>

<bundles_post_ra>
// kernel: decoder_forward.2
= control target key start
LH: loop header
LB: loop body
LE: loop exit
PB: predicated region body
PF: predicated region fallthrough
CT: control target
= control target key end

     0   :  { %vm61_vm0 = vcmask 254976   ;;  %v81_v0 = vlaneseq  ;;  %v292_v1 = vmov 0.0   ;;  %vm293_vm1 = vmmov 0   ;;  %s322_s1 = inlined_call_operand.vmem [shape: f32[8,32], index: 1, kind: input, shape index: {}]   ;;  %s323_s0 = inlined_call_operand.vmem [shape: s32[1,8], index: 0, kind: input, shape index: {}]   ;;  %s324_s2 = inlined_call_operand.vmem [shape: f32[1,2,32], index: 2, kind: output, shape index: {}]  }
   0x1   :  { %62 = vst.msk [vmem:[#allocation2] sm:$0x3] %vm61_vm0, %v292_v1  ;;  %284 = vmatprep.subr.mxu0 %v292_v1  ;;  %v63_v2 = vld [vmem:[%s322_s1] sm:$0xff]  ;;  %286 = vmatprep.mubr.msk.f32.mxu0 %vm293_vm1, %v292_v1  ;;  %v294_v5 = vmov 1.0  }
   0x2   :  { %v279_v3 = vld [vmem:[%s323_s0] ss:$0 sm:$0xff]  ;;  %285 = vmatpush3.msra.mxu0 %v63_v2  ;;  %v82_v4 = vshrl.u32 %v81_v0, 7 }
   0x4   :  { %vm184_vm2 = vcmp.eq.s32.totalorder %v279_v3, %v82_v4 }
   0x5   :  { %287 = vmatmul.mubr.msk.f32.vlgmr.msra.gmra.mxu0 %vm184_vm2, %v294_v5 }
   0x8   :  { %v187_v6 = vld [vmem:[#allocation2] sm:$0x3] }
  0xc5   :  { %v254_v7 = vpop.f32.mrf.mxu0 }
  0xc6   :  { %v258_v8 = vadd.f32 %v254_v7, %v187_v6 }
  0xc7   :  { %v288_v9 = vpop.f32.mrf.mxu0 }
  0xc8   :  { %260 = vst.msk [vmem:[#allocation2] sm:$0x3] %vm61_vm0, %v258_v8 }
  0xcf   :  { %v264_v10 = vld [vmem:[#allocation2] sm:$0x3] }
  0xd0   :  { %265 = vst.msk [vmem:[%s324_s2] sm:$0x3] %vm61_vm0, %v264_v10 }

// kernel: decoder_forward.3
= control target key start
LH: loop header
LB: loop body
LE: loop exit
PB: predicated region body
PF: predicated region fallthrough
CT: control target
= control target key end

     0   :  { %v263_v2 = vmov 0.0   ;;  %s332_s0 = inlined_call_operand.vmem [shape: f32[2,32], index: 0, kind: input, shape index: {}]   ;;  %s333_s1 = inlined_call_operand.vmem [shape: f32[1,2,32], index: 1, kind: input, shape index: {}]   ;;  %s334_s2 = inlined_call_operand.vmem [shape: f32[32,32], index: 2, kind: input, shape index: {}]   ;;  %s335_s3 = inlined_call_operand.vmem [shape: f32[32,32], index: 3, kind: input, shape index: {}]   ;;  %s336_s4 = inlined_call_operand.vmem [shape: f32[1,32], index: 4, kind: input, shape index: {}]   ;;  %s337_s5 = inlined_call_operand.hbm [shape: f32[2,32], index: 5, kind: output, shape index: {}]  }
   0x1   :  { %v31_v0 = vld [vmem:[%s335_s3 + $0x18] sm:$0xff]  ;;  %216 = vmatprep.subr.mxu0 %v263_v2  ;;  %227 = vmatprep.subr.mxu1 %v263_v2  ;;  %v30_v3 = vld [vmem:[%s335_s3 + $0x10] sm:$0xff]  ;;  %v29_v5 = vld [vmem:[%s335_s3 + $0x8] sm:$0xff] }
   0x2   :  { %v27_v1 = vld [vmem:[%s334_s2 + $0x18] sm:$0xff]  ;;  %v26_v4 = vld [vmem:[%s334_s2 + $0x10] sm:$0xff]  ;;  %217 = vmatpush3.msra.mxu0 %v31_v0  ;;  %v25_v6 = vld [vmem:[%s334_s2 + $0x8] sm:$0xff] }
   0x3   :  { %228 = vmatpush3.msra.mxu1 %v27_v1  ;;  %218 = vmatprep.subr.mxu0 %v263_v2 }
   0x4   :  { %229 = vmatprep.subr.mxu1 %v263_v2 }
   0x5   :  { %10 = vsyncpa [#allocation3], 0  ;;  %219 = vmatpush3.msra.mxu0 %v30_v3  ;;  %230 = vmatpush3.msra.mxu1 %v26_v4  ;;  %v28_v7 = vld [vmem:[%s335_s3] sm:$0xff]  ;;  %vm32_vm0 = vcmask 261120   ;;  %vm264_vm1 = vmmov 0   ;;  %s265_s13 = smov [#allocation2]  }
   0x6   :  { %220 = vmatprep.subr.mxu0 %v263_v2  ;;  %231 = vmatprep.subr.mxu1 %v263_v2  ;;  %v24_v8 = vld [vmem:[%s334_s2] sm:$0xff]  ;;  %vm187_vm2 = vcmask 254976  }
   0x7   :  { %221 = vmatpush3.msra.mxu0 %v29_v5  ;;  %232 = vmatpush3.msra.mxu1 %v25_v6  ;;  %v21_v9 = vld [vmem:[%s333_s1] sm:$0x3]  ;;  %s195_s1 = sshll.u32 %s265_s13, 4  ;;  %s196_s1 = int_to_ptr.vmem [resolvable:$true] %s195_s1 }
   0x8   :  { %222 = vmatprep.subr.mxu0 %v263_v2  ;;  %233 = vmatprep.subr.mxu1 %v263_v2  ;;  %v23_v10 = vld [vmem:[%s332_s0] sm:$0x3]  ;;  %s241_s0 = scalar_lea.vmem %s196_s1, 32  ;;  %p246_p1 = scmp.lt.s32.totalorder %s196_s1, %s196_s1 }
   0x9   :  { %223 = vmatpush3.msra.mxu0 %v28_v7  ;;  %224 = vmatprep.mubr.msk.f32.mxu0 %vm264_vm1, %v263_v2  ;;  %v205_v13 = vld [vmem:[%s336_s4] ss:$0 sm:$0xff]  ;;  %p242_p0 = scmp.ne.s32.totalorder %s196_s1, %s241_s0  ;;  %p247_p2 = scmp.lt.s32.totalorder %s241_s0, %s241_s0 }
   0xa   :  { %234 = vmatpush3.msra.mxu1 %v24_v8  ;;  %235 = vmatprep.mubr.msk.f32.mxu1 %vm264_vm1, %v263_v2 }
   0xb   :  { %225 = vmatmul.mubr.msk.f32.vlgmr.msra.gmra.mxu0 %vm32_vm0, %v21_v9  ;;  %236 = vmatmul.mubr.msk.f32.vlgmr.msra.gmra.mxu1 %vm32_vm0, %v23_v10  ;;  %p248_p3 = por %p247_p2, %p246_p1 }
   0xd   :  { %p249_p4 = pnand %p248_p3, %p242_p0 }
  0xcb   :  { %v102_v11 = vpop.f32.mrf.mxu0  ;;  %v175_v12 = vpop.f32.mrf.mxu1 }
  0xcc   :  { %v176_v14 = vadd.f32 %v175_v12, %v102_v11 }
  0xcd   :  { %v226_v15 = vpop.f32.mrf.mxu0  ;;  %v237_v16 = vpop.f32.mrf.mxu1 }
  0xce   :  { %v186_v17 = vadd.f32 %v205_v13, %v176_v14 }
  0xd0   :  { %188 = vst.msk [vmem:[#allocation2] sm:$0x3] %vm187_vm2, %v186_v17 }
  0xd1   :  { %252 = shalt.err (!%p249_p4)
}
  0xd2   :  { %198 = dma.vmem_to_hbm [thread:$0]  %s196_s1, 32, %s337_s5, [#allocation3]  }
  0xd3   :  { %261 = dma.done.wait [#allocation3], 32  }
  0xd4   :  { %262 = vsyncadd [#allocation3], 4294967264 }
  0xd5   :  { %202 = vsyncpa [#allocation3], 1 }

</bundles_post_ra>
